<compile_context>
chip_gen: v7x
topology: tpu7x:2x2x1
jax: 0.10.0
libtpu: 0.0.40
codegen_flags: <defaults>
</compile_context>

<pallas_src>
import functools

import jax
import jax.numpy as jnp
from jax import lax
from jax.experimental import pallas as pl
from jax.experimental.pallas import tpu as pltpu

_BN_EPS = 1e-5


def _mcbt_kernel(z1_ref, z2_ref, out_ref, *, lambda_bt: float, n_mc: int,
                 mc_tile: int, bs: int, use_gram: bool):
    step = pl.program_id(0)

    lam = jnp.float32(lambda_bt)
    inv_bs = jnp.float32(1.0 / bs)
    proj = z1_ref.shape[2]

    def batchnorm(x):
        # Training-mode BatchNorm1d(affine=False): batch mean, biased variance.
        mean = jnp.mean(x, axis=0, keepdims=True)
        var = jnp.mean(jnp.square(x - mean), axis=0, keepdims=True)
        return (x - mean) * lax.rsqrt(var + jnp.float32(_BN_EPS))

    total = jnp.float32(0.0)
    # Static, fully-unrolled loop over the MC samples in this block.
    for m in range(mc_tile):
        z1 = z1_ref[m].astype(jnp.float32)  # (bs, proj)
        z2 = z2_ref[m].astype(jnp.float32)  # (bs, proj)

        z1n = batchnorm(z1)
        z2n = batchnorm(z2)

        if use_gram:
            # S_raw = ||z1n^T z2n||_F^2 = sum( (z1n z1n^T) * (z2n z2n^T) ).
            # Cheaper when bs < proj: 2*bs^2*proj MACs vs proj^2*bs.
            g1 = lax.dot_general(
                z1n, z1n,
                dimension_numbers=(((1,), (1,)), ((), ())),
                preferred_element_type=jnp.float32,
            )  # (bs, bs)
            g2 = lax.dot_general(
                z2n, z2n,
                dimension_numbers=(((1,), (1,)), ((), ())),
                preferred_element_type=jnp.float32,
            )  # (bs, bs)
            s_raw = jnp.sum(g1 * g2)                 # bs^2 * sum(c^2)
        else:
            # raw[j, k] = sum_b z1n[b, j] * z2n[b, k]   (c = raw / bs)
            raw = lax.dot_general(
                z1n, z2n,
                dimension_numbers=(((0,), (0,)), ((), ())),
                preferred_element_type=jnp.float32,
            )  # (proj, proj)
            s_raw = jnp.sum(raw * raw)               # bs^2 * sum(c^2)

        # diag(raw) without touching the (proj, proj) matrix: (1, proj)
        diag_raw = jnp.sum(z1n * z2n, axis=0, keepdims=True)
        d2_raw = jnp.sum(diag_raw * diag_raw)        # bs^2 * sum(diag(c)^2)
        d1_raw = jnp.sum(diag_raw)                   # bs   * sum(diag(c))

        # loss_m = lam*sum(c^2) + (1-lam)*sum(diag(c)^2) - 2*sum(diag(c)) + proj
        loss_m = (lam * s_raw * inv_bs * inv_bs
                  + (jnp.float32(1.0) - lam) * d2_raw * inv_bs * inv_bs
                  - jnp.float32(2.0) * d1_raw * inv_bs
                  + jnp.float32(proj))

        # Mask out zero-padded MC samples (tail block when n_mc % mc_tile != 0).
        g = step * mc_tile + m
        loss_m = jnp.where(g < n_mc, loss_m, jnp.float32(0.0))
        total = total + loss_m

    # Lane-dense per-step partial output; no cross-step accumulator, so the
    # grid axis can be "parallel" (sharded across TensorCores on v7x).
    out_ref[...] = jnp.full((1, 8, 128), total, dtype=jnp.float32)


def mcbt_loss(z1: jax.Array, z2: jax.Array, *, lambda_bt: float,
              mc_tile: int | None = None) -> jax.Array:
    """Pallas implementation of MCBT_Loss.forward. z1, z2: (n_mc, bs, proj)."""
    n_mc, bs, proj = z1.shape
    assert z2.shape == (n_mc, bs, proj)

    if mc_tile is None:
        # Several MC samples per grid step, capped so the double-buffered
        # input blocks stay well inside the default scoped-VMEM limit.
        bytes_per_sample = bs * proj * 4
        budget_per_block = 2 * 1024 * 1024
        mc_tile = max(1, min(8, n_mc, budget_per_block // max(bytes_per_sample, 1)))

    num_steps = pl.cdiv(n_mc, mc_tile)
    padded = num_steps * mc_tile
    if padded != n_mc:
        pad = padded - n_mc
        # Zero-padded samples normalize to exact zeros (no NaN) and are masked
        # out inside the kernel.
        z1 = jnp.pad(z1, ((0, pad), (0, 0), (0, 0)))
        z2 = jnp.pad(z2, ((0, pad), (0, 0), (0, 0)))

    # Static choice of contraction path for sum(c^2) (see kernel docstring).
    use_gram = bs < proj

    kernel = functools.partial(
        _mcbt_kernel, lambda_bt=float(lambda_bt), n_mc=n_mc,
        mc_tile=mc_tile, bs=bs, use_gram=use_gram)

    out = pl.pallas_call(
        kernel,
        out_shape=jax.ShapeDtypeStruct((num_steps, 8, 128), jnp.float32),
        grid_spec=pltpu.PrefetchScalarGridSpec(
            num_scalar_prefetch=0,
            grid=(num_steps,),
            in_specs=[
                pl.BlockSpec((mc_tile, bs, proj), lambda i: (i, 0, 0)),
                pl.BlockSpec((mc_tile, bs, proj), lambda i: (i, 0, 0)),
            ],
            out_specs=pl.BlockSpec((1, 8, 128), lambda i: (i, 0, 0)),
        ),
        compiler_params=pltpu.CompilerParams(
            dimension_semantics=("parallel",),
        ),
    )(z1, z2)

    # Final mean over MC samples (each step's partial sum lives in [i, 0, 0]).
    return jnp.sum(out[:, 0, 0]) / jnp.float32(n_mc)


def mcbt_loss_reference(z1, z2, *, lambda_bt):
    """Pure-JAX reference mirroring the PyTorch module (for correctness check)."""
    n_mc, bs, proj = z1.shape

    def bn(x):
        mean = jnp.mean(x, axis=1, keepdims=True)
        var = jnp.mean((x - mean) ** 2, axis=1, keepdims=True)
        return (x - mean) / jnp.sqrt(var + _BN_EPS)

    z1n = bn(z1.astype(jnp.float32))
    z2n = bn(z2.astype(jnp.float32))
    c = jnp.einsum("bij,bjk->bik", jnp.transpose(z1n, (0, 2, 1)), z2n) / bs
    identity = jnp.eye(proj, dtype=jnp.float32)[None, :, :]
    c_diff = (c - identity) ** 2
    c_diff = jnp.where(identity.astype(bool), c_diff, c_diff * lambda_bt)
    return jnp.mean(jnp.sum(c_diff, axis=(1, 2)))


if __name__ == "__main__":
    lambda_bt = 0.005
    key = jax.random.PRNGKey(0)

    # Shape 1: n_mc divides mc_tile evenly (n_mc=4, batch=16, rep_dim=128),
    #          bs < proj -> batch-space Gram path.
    # Shape 2: exercises the padded-tail path (n_mc=10 -> mc_tile=8, 2 steps).
    # Shape 3: bs >= proj -> feature-space cross-correlation path.
    for (n_mc, bs, proj) in [(4, 16, 128), (10, 16, 128), (2, 256, 128)]:
        key, k1, k2 = jax.random.split(key, 3)
        z1 = jax.random.normal(k1, (n_mc, bs, proj), dtype=jnp.float32)
        z2 = jax.random.normal(k2, (n_mc, bs, proj), dtype=jnp.float32)

        loss = jax.block_until_ready(mcbt_loss(z1, z2, lambda_bt=lambda_bt))
        ref = jax.block_until_ready(
            mcbt_loss_reference(z1, z2, lambda_bt=lambda_bt))
        assert jnp.allclose(loss, ref, rtol=1e-4, atol=1e-4), (n_mc, loss, ref)

    print("KERNEL_OK")
</pallas_src>

<mosaic_0001>
module attributes {stable_mosaic.version = 11 : i64} {
  func.func @_mcbt_kernel(%arg0: i32, %arg1: memref<4x16x128xf32, #tpu.memory_space<vmem>>, %arg2: memref<4x16x128xf32, #tpu.memory_space<vmem>>, %arg3: memref<1x8x128xf32, #tpu.memory_space<vmem>>) attributes {dimension_semantics = [#tpu.dimension_semantics<parallel>], iteration_bounds = array<i64: 1>, scalar_prefetch = 0 : i64, scratch_operands = 0 : i64, tpu.core_type = #tpu.core_type<tc>, window_params = [{transform_indices = @transform_0, window_bounds = array<i64: 4, 16, 128>}, {transform_indices = @transform_1, window_bounds = array<i64: 4, 16, 128>}, {transform_indices = @transform_2, window_bounds = array<i64: 1, 8, 128>}]} {
    %c0 = arith.constant 0 : index
    %c0_0 = arith.constant 0 : index
    %c0_1 = arith.constant 0 : index
    %0 = vector.load %arg1[%c0, %c0_0, %c0_1] : memref<4x16x128xf32, #tpu.memory_space<vmem>>, vector<1x16x128xf32>
    %1 = vector.shape_cast %0 : vector<1x16x128xf32> to vector<16x128xf32>
    %c0_2 = arith.constant 0 : index
    %c0_3 = arith.constant 0 : index
    %c0_4 = arith.constant 0 : index
    %2 = vector.load %arg2[%c0_2, %c0_3, %c0_4] : memref<4x16x128xf32, #tpu.memory_space<vmem>>, vector<1x16x128xf32>
    %3 = vector.shape_cast %2 : vector<1x16x128xf32> to vector<16x128xf32>
    %cst = arith.constant dense<0.000000e+00> : vector<128xf32>
    %4 = vector.multi_reduction <add>, %1, %cst [0] : vector<16x128xf32> to vector<128xf32>
    %5 = vector.shape_cast %4 : vector<128xf32> to vector<1x128xf32>
    %cst_5 = arith.constant 1.600000e+01 : f32
    %6 = vector.broadcast %cst_5 : f32 to vector<1x128xf32>
    %7 = arith.divf %5, %6 : vector<1x128xf32>
    %8 = vector.broadcast %7 : vector<1x128xf32> to vector<16x128xf32>
    %9 = arith.subf %1, %8 : vector<16x128xf32>
    %10 = arith.mulf %9, %9 : vector<16x128xf32>
    %cst_6 = arith.constant dense<0.000000e+00> : vector<128xf32>
    %11 = vector.multi_reduction <add>, %10, %cst_6 [0] : vector<16x128xf32> to vector<128xf32>
    %12 = vector.shape_cast %11 : vector<128xf32> to vector<1x128xf32>
    %cst_7 = arith.constant 1.600000e+01 : f32
    %13 = vector.broadcast %cst_7 : f32 to vector<1x128xf32>
    %14 = arith.divf %12, %13 : vector<1x128xf32>
    %15 = vector.broadcast %7 : vector<1x128xf32> to vector<16x128xf32>
    %16 = arith.subf %1, %15 : vector<16x128xf32>
    %cst_8 = arith.constant 9.99999974E-6 : f32
    %17 = vector.broadcast %cst_8 : f32 to vector<1x128xf32>
    %18 = arith.addf %14, %17 : vector<1x128xf32>
    %19 = math.rsqrt %18 : vector<1x128xf32>
    %20 = vector.broadcast %19 : vector<1x128xf32> to vector<16x128xf32>
    %21 = arith.mulf %16, %20 : vector<16x128xf32>
    %cst_9 = arith.constant dense<0.000000e+00> : vector<128xf32>
    %22 = vector.multi_reduction <add>, %3, %cst_9 [0] : vector<16x128xf32> to vector<128xf32>
    %23 = vector.shape_cast %22 : vector<128xf32> to vector<1x128xf32>
    %cst_10 = arith.constant 1.600000e+01 : f32
    %24 = vector.broadcast %cst_10 : f32 to vector<1x128xf32>
    %25 = arith.divf %23, %24 : vector<1x128xf32>
    %26 = vector.broadcast %25 : vector<1x128xf32> to vector<16x128xf32>
    %27 = arith.subf %3, %26 : vector<16x128xf32>
    %28 = arith.mulf %27, %27 : vector<16x128xf32>
    %cst_11 = arith.constant dense<0.000000e+00> : vector<128xf32>
    %29 = vector.multi_reduction <add>, %28, %cst_11 [0] : vector<16x128xf32> to vector<128xf32>
    %30 = vector.shape_cast %29 : vector<128xf32> to vector<1x128xf32>
    %cst_12 = arith.constant 1.600000e+01 : f32
    %31 = vector.broadcast %cst_12 : f32 to vector<1x128xf32>
    %32 = arith.divf %30, %31 : vector<1x128xf32>
    %33 = vector.broadcast %25 : vector<1x128xf32> to vector<16x128xf32>
    %34 = arith.subf %3, %33 : vector<16x128xf32>
    %cst_13 = arith.constant 9.99999974E-6 : f32
    %35 = vector.broadcast %cst_13 : f32 to vector<1x128xf32>
    %36 = arith.addf %32, %35 : vector<1x128xf32>
    %37 = math.rsqrt %36 : vector<1x128xf32>
    %38 = vector.broadcast %37 : vector<1x128xf32> to vector<16x128xf32>
    %39 = arith.mulf %34, %38 : vector<16x128xf32>
    %cst_14 = arith.constant dense<0.000000e+00> : vector<16x16xf32>
    %40 = tpu.matmul %21, %21, %cst_14 {dimension_numbers = #tpu.dot_dimension_numbers<[1], [1], [0], [0], [0, 0, 1, 0], [], []>} : vector<16x128xf32>, vector<16x128xf32>, vector<16x16xf32> -> vector<16x16xf32>
    %cst_15 = arith.constant dense<0.000000e+00> : vector<16x16xf32>
    %41 = tpu.matmul %39, %39, %cst_15 {dimension_numbers = #tpu.dot_dimension_numbers<[1], [1], [0], [0], [0, 0, 1, 0], [], []>} : vector<16x128xf32>, vector<16x128xf32>, vector<16x16xf32> -> vector<16x16xf32>
    %42 = arith.mulf %40, %41 : vector<16x16xf32>
    %43 = vector.shape_cast %42 : vector<16x16xf32> to vector<1x16x16xf32>
    %cst_16 = arith.constant dense<0.000000e+00> : vector<1xf32>
    %44 = vector.multi_reduction <add>, %43, %cst_16 [1, 2] : vector<1x16x16xf32> to vector<1xf32>
    %45 = vector.shape_cast %44 : vector<1xf32> to vector<1x1x1xf32>
    %46 = vector.extract %45[0, 0, 0] : f32 from vector<1x1x1xf32>
    %47 = arith.mulf %21, %39 : vector<16x128xf32>
    %cst_17 = arith.constant dense<0.000000e+00> : vector<128xf32>
    %48 = vector.multi_reduction <add>, %47, %cst_17 [0] : vector<16x128xf32> to vector<128xf32>
    %49 = vector.shape_cast %48 : vector<128xf32> to vector<1x128xf32>
    %50 = arith.mulf %49, %49 : vector<1x128xf32>
    %51 = vector.shape_cast %50 : vector<1x128xf32> to vector<1x1x128xf32>
    %cst_18 = arith.constant dense<0.000000e+00> : vector<1xf32>
    %52 = vector.multi_reduction <add>, %51, %cst_18 [1, 2] : vector<1x1x128xf32> to vector<1xf32>
    %53 = vector.shape_cast %52 : vector<1xf32> to vector<1x1x1xf32>
    %54 = vector.extract %53[0, 0, 0] : f32 from vector<1x1x1xf32>
    %55 = vector.shape_cast %49 : vector<1x128xf32> to vector<1x1x128xf32>
    %cst_19 = arith.constant dense<0.000000e+00> : vector<1xf32>
    %56 = vector.multi_reduction <add>, %55, %cst_19 [1, 2] : vector<1x1x128xf32> to vector<1xf32>
    %57 = vector.shape_cast %56 : vector<1xf32> to vector<1x1x1xf32>
    %58 = vector.extract %57[0, 0, 0] : f32 from vector<1x1x1xf32>
    %cst_20 = arith.constant 5.000000e-03 : f32
    %59 = arith.mulf %cst_20, %46 : f32
    %cst_21 = arith.constant 6.250000e-02 : f32
    %60 = arith.mulf %59, %cst_21 : f32
    %cst_22 = arith.constant 6.250000e-02 : f32
    %61 = arith.mulf %60, %cst_22 : f32
    %cst_23 = arith.constant 1.000000e+00 : f32
    %cst_24 = arith.constant 5.000000e-03 : f32
    %62 = arith.subf %cst_23, %cst_24 : f32
    %63 = arith.mulf %62, %54 : f32
    %cst_25 = arith.constant 6.250000e-02 : f32
    %64 = arith.mulf %63, %cst_25 : f32
    %cst_26 = arith.constant 6.250000e-02 : f32
    %65 = arith.mulf %64, %cst_26 : f32
    %66 = arith.addf %61, %65 : f32
    %cst_27 = arith.constant 2.000000e+00 : f32
    %67 = arith.mulf %cst_27, %58 : f32
    %cst_28 = arith.constant 6.250000e-02 : f32
    %68 = arith.mulf %67, %cst_28 : f32
    %69 = arith.subf %66, %68 : f32
    %cst_29 = arith.constant 1.280000e+02 : f32
    %70 = arith.addf %69, %cst_29 : f32
    %c4_i32 = arith.constant 4 : i32
    %71 = arith.muli %arg0, %c4_i32 : i32
    %c0_i32 = arith.constant 0 : i32
    %72 = arith.addi %71, %c0_i32 : i32
    %c4_i32_30 = arith.constant 4 : i32
    %73 = arith.cmpi slt, %72, %c4_i32_30 : i32
    %cst_31 = arith.constant 0.000000e+00 : f32
    %74 = arith.select %73, %70, %cst_31 : f32
    %cst_32 = arith.constant 0.000000e+00 : f32
    %75 = arith.addf %cst_32, %74 : f32
    %c1 = arith.constant 1 : index
    %c0_33 = arith.constant 0 : index
    %c0_34 = arith.constant 0 : index
    %76 = vector.load %arg1[%c1, %c0_33, %c0_34] : memref<4x16x128xf32, #tpu.memory_space<vmem>>, vector<1x16x128xf32>
    %77 = vector.shape_cast %76 : vector<1x16x128xf32> to vector<16x128xf32>
    %c1_35 = arith.constant 1 : index
    %c0_36 = arith.constant 0 : index
    %c0_37 = arith.constant 0 : index
    %78 = vector.load %arg2[%c1_35, %c0_36, %c0_37] : memref<4x16x128xf32, #tpu.memory_space<vmem>>, vector<1x16x128xf32>
    %79 = vector.shape_cast %78 : vector<1x16x128xf32> to vector<16x128xf32>
    %cst_38 = arith.constant dense<0.000000e+00> : vector<128xf32>
    %80 = vector.multi_reduction <add>, %77, %cst_38 [0] : vector<16x128xf32> to vector<128xf32>
    %81 = vector.shape_cast %80 : vector<128xf32> to vector<1x128xf32>
    %cst_39 = arith.constant 1.600000e+01 : f32
    %82 = vector.broadcast %cst_39 : f32 to vector<1x128xf32>
    %83 = arith.divf %81, %82 : vector<1x128xf32>
    %84 = vector.broadcast %83 : vector<1x128xf32> to vector<16x128xf32>
    %85 = arith.subf %77, %84 : vector<16x128xf32>
    %86 = arith.mulf %85, %85 : vector<16x128xf32>
    %cst_40 = arith.constant dense<0.000000e+00> : vector<128xf32>
    %87 = vector.multi_reduction <add>, %86, %cst_40 [0] : vector<16x128xf32> to vector<128xf32>
    %88 = vector.shape_cast %87 : vector<128xf32> to vector<1x128xf32>
    %cst_41 = arith.constant 1.600000e+01 : f32
    %89 = vector.broadcast %cst_41 : f32 to vector<1x128xf32>
    %90 = arith.divf %88, %89 : vector<1x128xf32>
    %91 = vector.broadcast %83 : vector<1x128xf32> to vector<16x128xf32>
    %92 = arith.subf %77, %91 : vector<16x128xf32>
    %cst_42 = arith.constant 9.99999974E-6 : f32
    %93 = vector.broadcast %cst_42 : f32 to vector<1x128xf32>
    %94 = arith.addf %90, %93 : vector<1x128xf32>
    %95 = math.rsqrt %94 : vector<1x128xf32>
    %96 = vector.broadcast %95 : vector<1x128xf32> to vector<16x128xf32>
    %97 = arith.mulf %92, %96 : vector<16x128xf32>
    %cst_43 = arith.constant dense<0.000000e+00> : vector<128xf32>
    %98 = vector.multi_reduction <add>, %79, %cst_43 [0] : vector<16x128xf32> to vector<128xf32>
    %99 = vector.shape_cast %98 : vector<128xf32> to vector<1x128xf32>
    %cst_44 = arith.constant 1.600000e+01 : f32
    %100 = vector.broadcast %cst_44 : f32 to vector<1x128xf32>
    %101 = arith.divf %99, %100 : vector<1x128xf32>
    %102 = vector.broadcast %101 : vector<1x128xf32> to vector<16x128xf32>
    %103 = arith.subf %79, %102 : vector<16x128xf32>
    %104 = arith.mulf %103, %103 : vector<16x128xf32>
    %cst_45 = arith.constant dense<0.000000e+00> : vector<128xf32>
    %105 = vector.multi_reduction <add>, %104, %cst_45 [0] : vector<16x128xf32> to vector<128xf32>
    %106 = vector.shape_cast %105 : vector<128xf32> to vector<1x128xf32>
    %cst_46 = arith.constant 1.600000e+01 : f32
    %107 = vector.broadcast %cst_46 : f32 to vector<1x128xf32>
    %108 = arith.divf %106, %107 : vector<1x128xf32>
    %109 = vector.broadcast %101 : vector<1x128xf32> to vector<16x128xf32>
    %110 = arith.subf %79, %109 : vector<16x128xf32>
    %cst_47 = arith.constant 9.99999974E-6 : f32
    %111 = vector.broadcast %cst_47 : f32 to vector<1x128xf32>
    %112 = arith.addf %108, %111 : vector<1x128xf32>
    %113 = math.rsqrt %112 : vector<1x128xf32>
    %114 = vector.broadcast %113 : vector<1x128xf32> to vector<16x128xf32>
    %115 = arith.mulf %110, %114 : vector<16x128xf32>
    %cst_48 = arith.constant dense<0.000000e+00> : vector<16x16xf32>
    %116 = tpu.matmul %97, %97, %cst_48 {dimension_numbers = #tpu.dot_dimension_numbers<[1], [1], [0], [0], [0, 0, 1, 0], [], []>} : vector<16x128xf32>, vector<16x128xf32>, vector<16x16xf32> -> vector<16x16xf32>
    %cst_49 = arith.constant dense<0.000000e+00> : vector<16x16xf32>
    %117 = tpu.matmul %115, %115, %cst_49 {dimension_numbers = #tpu.dot_dimension_numbers<[1], [1], [0], [0], [0, 0, 1, 0], [], []>} : vector<16x128xf32>, vector<16x128xf32>, vector<16x16xf32> -> vector<16x16xf32>
    %118 = arith.mulf %116, %117 : vector<16x16xf32>
    %119 = vector.shape_cast %118 : vector<16x16xf32> to vector<1x16x16xf32>
    %cst_50 = arith.constant dense<0.000000e+00> : vector<1xf32>
    %120 = vector.multi_reduction <add>, %119, %cst_50 [1, 2] : vector<1x16x16xf32> to vector<1xf32>
    %121 = vector.shape_cast %120 : vector<1xf32> to vector<1x1x1xf32>
    %122 = vector.extract %121[0, 0, 0] : f32 from vector<1x1x1xf32>
    %123 = arith.mulf %97, %115 : vector<16x128xf32>
    %cst_51 = arith.constant dense<0.000000e+00> : vector<128xf32>
    %124 = vector.multi_reduction <add>, %123, %cst_51 [0] : vector<16x128xf32> to vector<128xf32>
    %125 = vector.shape_cast %124 : vector<128xf32> to vector<1x128xf32>
    %126 = arith.mulf %125, %125 : vector<1x128xf32>
    %127 = vector.shape_cast %126 : vector<1x128xf32> to vector<1x1x128xf32>
    %cst_52 = arith.constant dense<0.000000e+00> : vector<1xf32>
    %128 = vector.multi_reduction <add>, %127, %cst_52 [1, 2] : vector<1x1x128xf32> to vector<1xf32>
    %129 = vector.shape_cast %128 : vector<1xf32> to vector<1x1x1xf32>
    %130 = vector.extract %129[0, 0, 0] : f32 from vector<1x1x1xf32>
    %131 = vector.shape_cast %125 : vector<1x128xf32> to vector<1x1x128xf32>
    %cst_53 = arith.constant dense<0.000000e+00> : vector<1xf32>
    %132 = vector.multi_reduction <add>, %131, %cst_53 [1, 2] : vector<1x1x128xf32> to vector<1xf32>
    %133 = vector.shape_cast %132 : vector<1xf32> to vector<1x1x1xf32>
    %134 = vector.extract %133[0, 0, 0] : f32 from vector<1x1x1xf32>
    %cst_54 = arith.constant 5.000000e-03 : f32
    %135 = arith.mulf %cst_54, %122 : f32
    %cst_55 = arith.constant 6.250000e-02 : f32
    %136 = arith.mulf %135, %cst_55 : f32
    %cst_56 = arith.constant 6.250000e-02 : f32
    %137 = arith.mulf %136, %cst_56 : f32
    %cst_57 = arith.constant 1.000000e+00 : f32
    %cst_58 = arith.constant 5.000000e-03 : f32
    %138 = arith.subf %cst_57, %cst_58 : f32
    %139 = arith.mulf %138, %130 : f32
    %cst_59 = arith.constant 6.250000e-02 : f32
    %140 = arith.mulf %139, %cst_59 : f32
    %cst_60 = arith.constant 6.250000e-02 : f32
    %141 = arith.mulf %140, %cst_60 : f32
    %142 = arith.addf %137, %141 : f32
    %cst_61 = arith.constant 2.000000e+00 : f32
    %143 = arith.mulf %cst_61, %134 : f32
    %cst_62 = arith.constant 6.250000e-02 : f32
    %144 = arith.mulf %143, %cst_62 : f32
    %145 = arith.subf %142, %144 : f32
    %cst_63 = arith.constant 1.280000e+02 : f32
    %146 = arith.addf %145, %cst_63 : f32
    %c4_i32_64 = arith.constant 4 : i32
    %147 = arith.muli %arg0, %c4_i32_64 : i32
    %c1_i32 = arith.constant 1 : i32
    %148 = arith.addi %147, %c1_i32 : i32
    %c4_i32_65 = arith.constant 4 : i32
    %149 = arith.cmpi slt, %148, %c4_i32_65 : i32
    %cst_66 = arith.constant 0.000000e+00 : f32
    %150 = arith.select %149, %146, %cst_66 : f32
    %151 = arith.addf %75, %150 : f32
    %c2 = arith.constant 2 : index
    %c0_67 = arith.constant 0 : index
    %c0_68 = arith.constant 0 : index
    %152 = vector.load %arg1[%c2, %c0_67, %c0_68] : memref<4x16x128xf32, #tpu.memory_space<vmem>>, vector<1x16x128xf32>
    %153 = vector.shape_cast %152 : vector<1x16x128xf32> to vector<16x128xf32>
    %c2_69 = arith.constant 2 : index
    %c0_70 = arith.constant 0 : index
    %c0_71 = arith.constant 0 : index
    %154 = vector.load %arg2[%c2_69, %c0_70, %c0_71] : memref<4x16x128xf32, #tpu.memory_space<vmem>>, vector<1x16x128xf32>
    %155 = vector.shape_cast %154 : vector<1x16x128xf32> to vector<16x128xf32>
    %cst_72 = arith.constant dense<0.000000e+00> : vector<128xf32>
    %156 = vector.multi_reduction <add>, %153, %cst_72 [0] : vector<16x128xf32> to vector<128xf32>
    %157 = vector.shape_cast %156 : vector<128xf32> to vector<1x128xf32>
    %cst_73 = arith.constant 1.600000e+01 : f32
    %158 = vector.broadcast %cst_73 : f32 to vector<1x128xf32>
    %159 = arith.divf %157, %158 : vector<1x128xf32>
    %160 = vector.broadcast %159 : vector<1x128xf32> to vector<16x128xf32>
    %161 = arith.subf %153, %160 : vector<16x128xf32>
    %162 = arith.mulf %161, %161 : vector<16x128xf32>
    %cst_74 = arith.constant dense<0.000000e+00> : vector<128xf32>
    %163 = vector.multi_reduction <add>, %162, %cst_74 [0] : vector<16x128xf32> to vector<128xf32>
    %164 = vector.shape_cast %163 : vector<128xf32> to vector<1x128xf32>
    %cst_75 = arith.constant 1.600000e+01 : f32
    %165 = vector.broadcast %cst_75 : f32 to vector<1x128xf32>
    %166 = arith.divf %164, %165 : vector<1x128xf32>
    %167 = vector.broadcast %159 : vector<1x128xf32> to vector<16x128xf32>
    %168 = arith.subf %153, %167 : vector<16x128xf32>
    %cst_76 = arith.constant 9.99999974E-6 : f32
    %169 = vector.broadcast %cst_76 : f32 to vector<1x128xf32>
    %170 = arith.addf %166, %169 : vector<1x128xf32>
    %171 = math.rsqrt %170 : vector<1x128xf32>
    %172 = vector.broadcast %171 : vector<1x128xf32> to vector<16x128xf32>
    %173 = arith.mulf %168, %172 : vector<16x128xf32>
    %cst_77 = arith.constant dense<0.000000e+00> : vector<128xf32>
    %174 = vector.multi_reduction <add>, %155, %cst_77 [0] : vector<16x128xf32> to vector<128xf32>
    %175 = vector.shape_cast %174 : vector<128xf32> to vector<1x128xf32>
    %cst_78 = arith.constant 1.600000e+01 : f32
    %176 = vector.broadcast %cst_78 : f32 to vector<1x128xf32>
    %177 = arith.divf %175, %176 : vector<1x128xf32>
    %178 = vector.broadcast %177 : vector<1x128xf32> to vector<16x128xf32>
    %179 = arith.subf %155, %178 : vector<16x128xf32>
    %180 = arith.mulf %179, %179 : vector<16x128xf32>
    %cst_79 = arith.constant dense<0.000000e+00> : vector<128xf32>
    %181 = vector.multi_reduction <add>, %180, %cst_79 [0] : vector<16x128xf32> to vector<128xf32>
    %182 = vector.shape_cast %181 : vector<128xf32> to vector<1x128xf32>
    %cst_80 = arith.constant 1.600000e+01 : f32
    %183 = vector.broadcast %cst_80 : f32 to vector<1x128xf32>
    %184 = arith.divf %182, %183 : vector<1x128xf32>
    %185 = vector.broadcast %177 : vector<1x128xf32> to vector<16x128xf32>
    %186 = arith.subf %155, %185 : vector<16x128xf32>
    %cst_81 = arith.constant 9.99999974E-6 : f32
    %187 = vector.broadcast %cst_81 : f32 to vector<1x128xf32>
    %188 = arith.addf %184, %187 : vector<1x128xf32>
    %189 = math.rsqrt %188 : vector<1x128xf32>
    %190 = vector.broadcast %189 : vector<1x128xf32> to vector<16x128xf32>
    %191 = arith.mulf %186, %190 : vector<16x128xf32>
    %cst_82 = arith.constant dense<0.000000e+00> : vector<16x16xf32>
    %192 = tpu.matmul %173, %173, %cst_82 {dimension_numbers = #tpu.dot_dimension_numbers<[1], [1], [0], [0], [0, 0, 1, 0], [], []>} : vector<16x128xf32>, vector<16x128xf32>, vector<16x16xf32> -> vector<16x16xf32>
    %cst_83 = arith.constant dense<0.000000e+00> : vector<16x16xf32>
    %193 = tpu.matmul %191, %191, %cst_83 {dimension_numbers = #tpu.dot_dimension_numbers<[1], [1], [0], [0], [0, 0, 1, 0], [], []>} : vector<16x128xf32>, vector<16x128xf32>, vector<16x16xf32> -> vector<16x16xf32>
    %194 = arith.mulf %192, %193 : vector<16x16xf32>
    %195 = vector.shape_cast %194 : vector<16x16xf32> to vector<1x16x16xf32>
    %cst_84 = arith.constant dense<0.000000e+00> : vector<1xf32>
    %196 = vector.multi_reduction <add>, %195, %cst_84 [1, 2] : vector<1x16x16xf32> to vector<1xf32>
    %197 = vector.shape_cast %196 : vector<1xf32> to vector<1x1x1xf32>
    %198 = vector.extract %197[0, 0, 0] : f32 from vector<1x1x1xf32>
    %199 = arith.mulf %173, %191 : vector<16x128xf32>
    %cst_85 = arith.constant dense<0.000000e+00> : vector<128xf32>
    %200 = vector.multi_reduction <add>, %199, %cst_85 [0] : vector<16x128xf32> to vector<128xf32>
    %201 = vector.shape_cast %200 : vector<128xf32> to vector<1x128xf32>
    %202 = arith.mulf %201, %201 : vector<1x128xf32>
    %203 = vector.shape_cast %202 : vector<1x128xf32> to vector<1x1x128xf32>
    %cst_86 = arith.constant dense<0.000000e+00> : vector<1xf32>
    %204 = vector.multi_reduction <add>, %203, %cst_86 [1, 2] : vector<1x1x128xf32> to vector<1xf32>
    %205 = vector.shape_cast %204 : vector<1xf32> to vector<1x1x1xf32>
    %206 = vector.extract %205[0, 0, 0] : f32 from vector<1x1x1xf32>
    %207 = vector.shape_cast %201 : vector<1x128xf32> to vector<1x1x128xf32>
    %cst_87 = arith.constant dense<0.000000e+00> : vector<1xf32>
    %208 = vector.multi_reduction <add>, %207, %cst_87 [1, 2] : vector<1x1x128xf32> to vector<1xf32>
    %209 = vector.shape_cast %208 : vector<1xf32> to vector<1x1x1xf32>
    %210 = vector.extract %209[0, 0, 0] : f32 from vector<1x1x1xf32>
    %cst_88 = arith.constant 5.000000e-03 : f32
    %211 = arith.mulf %cst_88, %198 : f32
    %cst_89 = arith.constant 6.250000e-02 : f32
    %212 = arith.mulf %211, %cst_89 : f32
    %cst_90 = arith.constant 6.250000e-02 : f32
    %213 = arith.mulf %212, %cst_90 : f32
    %cst_91 = arith.constant 1.000000e+00 : f32
    %cst_92 = arith.constant 5.000000e-03 : f32
    %214 = arith.subf %cst_91, %cst_92 : f32
    %215 = arith.mulf %214, %206 : f32
    %cst_93 = arith.constant 6.250000e-02 : f32
    %216 = arith.mulf %215, %cst_93 : f32
    %cst_94 = arith.constant 6.250000e-02 : f32
    %217 = arith.mulf %216, %cst_94 : f32
    %218 = arith.addf %213, %217 : f32
    %cst_95 = arith.constant 2.000000e+00 : f32
    %219 = arith.mulf %cst_95, %210 : f32
    %cst_96 = arith.constant 6.250000e-02 : f32
    %220 = arith.mulf %219, %cst_96 : f32
    %221 = arith.subf %218, %220 : f32
    %cst_97 = arith.constant 1.280000e+02 : f32
    %222 = arith.addf %221, %cst_97 : f32
    %c4_i32_98 = arith.constant 4 : i32
    %223 = arith.muli %arg0, %c4_i32_98 : i32
    %c2_i32 = arith.constant 2 : i32
    %224 = arith.addi %223, %c2_i32 : i32
    %c4_i32_99 = arith.constant 4 : i32
    %225 = arith.cmpi slt, %224, %c4_i32_99 : i32
    %cst_100 = arith.constant 0.000000e+00 : f32
    %226 = arith.select %225, %222, %cst_100 : f32
    %227 = arith.addf %151, %226 : f32
    %c3 = arith.constant 3 : index
    %c0_101 = arith.constant 0 : index
    %c0_102 = arith.constant 0 : index
    %228 = vector.load %arg1[%c3, %c0_101, %c0_102] : memref<4x16x128xf32, #tpu.memory_space<vmem>>, vector<1x16x128xf32>
    %229 = vector.shape_cast %228 : vector<1x16x128xf32> to vector<16x128xf32>
    %c3_103 = arith.constant 3 : index
    %c0_104 = arith.constant 0 : index
    %c0_105 = arith.constant 0 : index
    %230 = vector.load %arg2[%c3_103, %c0_104, %c0_105] : memref<4x16x128xf32, #tpu.memory_space<vmem>>, vector<1x16x128xf32>
    %231 = vector.shape_cast %230 : vector<1x16x128xf32> to vector<16x128xf32>
    %cst_106 = arith.constant dense<0.000000e+00> : vector<128xf32>
    %232 = vector.multi_reduction <add>, %229, %cst_106 [0] : vector<16x128xf32> to vector<128xf32>
    %233 = vector.shape_cast %232 : vector<128xf32> to vector<1x128xf32>
    %cst_107 = arith.constant 1.600000e+01 : f32
    %234 = vector.broadcast %cst_107 : f32 to vector<1x128xf32>
    %235 = arith.divf %233, %234 : vector<1x128xf32>
    %236 = vector.broadcast %235 : vector<1x128xf32> to vector<16x128xf32>
    %237 = arith.subf %229, %236 : vector<16x128xf32>
    %238 = arith.mulf %237, %237 : vector<16x128xf32>
    %cst_108 = arith.constant dense<0.000000e+00> : vector<128xf32>
    %239 = vector.multi_reduction <add>, %238, %cst_108 [0] : vector<16x128xf32> to vector<128xf32>
    %240 = vector.shape_cast %239 : vector<128xf32> to vector<1x128xf32>
    %cst_109 = arith.constant 1.600000e+01 : f32
    %241 = vector.broadcast %cst_109 : f32 to vector<1x128xf32>
    %242 = arith.divf %240, %241 : vector<1x128xf32>
    %243 = vector.broadcast %235 : vector<1x128xf32> to vector<16x128xf32>
    %244 = arith.subf %229, %243 : vector<16x128xf32>
    %cst_110 = arith.constant 9.99999974E-6 : f32
    %245 = vector.broadcast %cst_110 : f32 to vector<1x128xf32>
    %246 = arith.addf %242, %245 : vector<1x128xf32>
    %247 = math.rsqrt %246 : vector<1x128xf32>
    %248 = vector.broadcast %247 : vector<1x128xf32> to vector<16x128xf32>
    %249 = arith.mulf %244, %248 : vector<16x128xf32>
    %cst_111 = arith.constant dense<0.000000e+00> : vector<128xf32>
    %250 = vector.multi_reduction <add>, %231, %cst_111 [0] : vector<16x128xf32> to vector<128xf32>
    %251 = vector.shape_cast %250 : vector<128xf32> to vector<1x128xf32>
    %cst_112 = arith.constant 1.600000e+01 : f32
    %252 = vector.broadcast %cst_112 : f32 to vector<1x128xf32>
    %253 = arith.divf %251, %252 : vector<1x128xf32>
    %254 = vector.broadcast %253 : vector<1x128xf32> to vector<16x128xf32>
    %255 = arith.subf %231, %254 : vector<16x128xf32>
    %256 = arith.mulf %255, %255 : vector<16x128xf32>
    %cst_113 = arith.constant dense<0.000000e+00> : vector<128xf32>
    %257 = vector.multi_reduction <add>, %256, %cst_113 [0] : vector<16x128xf32> to vector<128xf32>
    %258 = vector.shape_cast %257 : vector<128xf32> to vector<1x128xf32>
    %cst_114 = arith.constant 1.600000e+01 : f32
    %259 = vector.broadcast %cst_114 : f32 to vector<1x128xf32>
    %260 = arith.divf %258, %259 : vector<1x128xf32>
    %261 = vector.broadcast %253 : vector<1x128xf32> to vector<16x128xf32>
    %262 = arith.subf %231, %261 : vector<16x128xf32>
    %cst_115 = arith.constant 9.99999974E-6 : f32
    %263 = vector.broadcast %cst_115 : f32 to vector<1x128xf32>
    %264 = arith.addf %260, %263 : vector<1x128xf32>
    %265 = math.rsqrt %264 : vector<1x128xf32>
    %266 = vector.broadcast %265 : vector<1x128xf32> to vector<16x128xf32>
    %267 = arith.mulf %262, %266 : vector<16x128xf32>
    %cst_116 = arith.constant dense<0.000000e+00> : vector<16x16xf32>
    %268 = tpu.matmul %249, %249, %cst_116 {dimension_numbers = #tpu.dot_dimension_numbers<[1], [1], [0], [0], [0, 0, 1, 0], [], []>} : vector<16x128xf32>, vector<16x128xf32>, vector<16x16xf32> -> vector<16x16xf32>
    %cst_117 = arith.constant dense<0.000000e+00> : vector<16x16xf32>
    %269 = tpu.matmul %267, %267, %cst_117 {dimension_numbers = #tpu.dot_dimension_numbers<[1], [1], [0], [0], [0, 0, 1, 0], [], []>} : vector<16x128xf32>, vector<16x128xf32>, vector<16x16xf32> -> vector<16x16xf32>
    %270 = arith.mulf %268, %269 : vector<16x16xf32>
    %271 = vector.shape_cast %270 : vector<16x16xf32> to vector<1x16x16xf32>
    %cst_118 = arith.constant dense<0.000000e+00> : vector<1xf32>
    %272 = vector.multi_reduction <add>, %271, %cst_118 [1, 2] : vector<1x16x16xf32> to vector<1xf32>
    %273 = vector.shape_cast %272 : vector<1xf32> to vector<1x1x1xf32>
    %274 = vector.extract %273[0, 0, 0] : f32 from vector<1x1x1xf32>
    %275 = arith.mulf %249, %267 : vector<16x128xf32>
    %cst_119 = arith.constant dense<0.000000e+00> : vector<128xf32>
    %276 = vector.multi_reduction <add>, %275, %cst_119 [0] : vector<16x128xf32> to vector<128xf32>
    %277 = vector.shape_cast %276 : vector<128xf32> to vector<1x128xf32>
    %278 = arith.mulf %277, %277 : vector<1x128xf32>
    %279 = vector.shape_cast %278 : vector<1x128xf32> to vector<1x1x128xf32>
    %cst_120 = arith.constant dense<0.000000e+00> : vector<1xf32>
    %280 = vector.multi_reduction <add>, %279, %cst_120 [1, 2] : vector<1x1x128xf32> to vector<1xf32>
    %281 = vector.shape_cast %280 : vector<1xf32> to vector<1x1x1xf32>
    %282 = vector.extract %281[0, 0, 0] : f32 from vector<1x1x1xf32>
    %283 = vector.shape_cast %277 : vector<1x128xf32> to vector<1x1x128xf32>
    %cst_121 = arith.constant dense<0.000000e+00> : vector<1xf32>
    %284 = vector.multi_reduction <add>, %283, %cst_121 [1, 2] : vector<1x1x128xf32> to vector<1xf32>
    %285 = vector.shape_cast %284 : vector<1xf32> to vector<1x1x1xf32>
    %286 = vector.extract %285[0, 0, 0] : f32 from vector<1x1x1xf32>
    %cst_122 = arith.constant 5.000000e-03 : f32
    %287 = arith.mulf %cst_122, %274 : f32
    %cst_123 = arith.constant 6.250000e-02 : f32
    %288 = arith.mulf %287, %cst_123 : f32
    %cst_124 = arith.constant 6.250000e-02 : f32
    %289 = arith.mulf %288, %cst_124 : f32
    %cst_125 = arith.constant 1.000000e+00 : f32
    %cst_126 = arith.constant 5.000000e-03 : f32
    %290 = arith.subf %cst_125, %cst_126 : f32
    %291 = arith.mulf %290, %282 : f32
    %cst_127 = arith.constant 6.250000e-02 : f32
    %292 = arith.mulf %291, %cst_127 : f32
    %cst_128 = arith.constant 6.250000e-02 : f32
    %293 = arith.mulf %292, %cst_128 : f32
    %294 = arith.addf %289, %293 : f32
    %cst_129 = arith.constant 2.000000e+00 : f32
    %295 = arith.mulf %cst_129, %286 : f32
    %cst_130 = arith.constant 6.250000e-02 : f32
    %296 = arith.mulf %295, %cst_130 : f32
    %297 = arith.subf %294, %296 : f32
    %cst_131 = arith.constant 1.280000e+02 : f32
    %298 = arith.addf %297, %cst_131 : f32
    %c4_i32_132 = arith.constant 4 : i32
    %299 = arith.muli %arg0, %c4_i32_132 : i32
    %c3_i32 = arith.constant 3 : i32
    %300 = arith.addi %299, %c3_i32 : i32
    %c4_i32_133 = arith.constant 4 : i32
    %301 = arith.cmpi slt, %300, %c4_i32_133 : i32
    %cst_134 = arith.constant 0.000000e+00 : f32
    %302 = arith.select %301, %298, %cst_134 : f32
    %303 = arith.addf %227, %302 : f32
    %304 = vector.broadcast %303 : f32 to vector<1x8x128xf32>
    %c0_135 = arith.constant 0 : index
    %c0_136 = arith.constant 0 : index
    %c0_137 = arith.constant 0 : index
    %305 = vector.load %arg3[%c0_135, %c0_136, %c0_137] : memref<1x8x128xf32, #tpu.memory_space<vmem>>, vector<1x8x128xf32>
    tpu.vector_store %arg3[%c0_135, %c0_136, %c0_137], %304 {strides = array<i32>} : memref<1x8x128xf32, #tpu.memory_space<vmem>>, vector<1x8x128xf32>,
    return
  }
  func.func @transform_0(%arg0: i32) -> (i32, i32, i32) {
    %c0_i32 = arith.constant 0 : i32
    %c0_i32_0 = arith.constant 0 : i32
    %c0_i32_1 = arith.constant 0 : i32
    return %arg0, %c0_i32, %c0_i32_0 : i32, i32, i32
  }
  func.func @transform_1(%arg0: i32) -> (i32, i32, i32) {
    %c0_i32 = arith.constant 0 : i32
    %c0_i32_0 = arith.constant 0 : i32
    %c0_i32_1 = arith.constant 0 : i32
    return %arg0, %c0_i32, %c0_i32_0 : i32, i32, i32
  }
  func.func @transform_2(%arg0: i32) -> (i32, i32, i32) {
    %c0_i32 = arith.constant 0 : i32
    %c0_i32_0 = arith.constant 0 : i32
    %c0_i32_1 = arith.constant 0 : i32
    return %arg0, %c0_i32, %c0_i32_0 : i32, i32, i32
  }
}

</mosaic_0001>

<bundles_post_ra>
// kernel: tpu_custom_call.1
= control target key start
LH: loop header
LB: loop body
LE: loop exit
PB: predicated region body
PF: predicated region fallthrough
CT: control target
= control target key end

     0   :  { %7 = vsyncpa [#allocation3], 0  ;;  %s1591_s0 = inlined_call_operand.hbm [shape: f32[4,16,128], index: 0, kind: input, shape index: {}]   ;;  %s1592_s1 = inlined_call_operand.hbm [shape: f32[4,16,128], index: 1, kind: input, shape index: {}]   ;;  %s1593_s2 = inlined_call_operand.hbm [shape: f32[1,8,128], index: 2, kind: output, shape index: {}]  }
   0x1   :  { %8 = vsyncpa [#allocation6], 0 }
   0x2   :  { %9 = vsyncpa [#allocation4], 0  ;;  %s1348_s9 = smov [#allocation2]   ;;  %s1276_s13 = scalar_lea.hbm %s1591_s0, 1024 }
   0x3   :  { %s15_s10 = sshll.u32 %s1348_s9, 4  ;;  %p1277_p0 = scmp.ne.s32.totalorder %s1591_s0, %s1276_s13  ;;  %s16_s10 = int_to_ptr.vmem [resolvable:$true] %s15_s10 }
   0x4   :  { %p1280_p1 = scmp.lt.u32.totalorder %s1276_s13, %s1591_s0 }
   0x6   :  { %p1282_p2 = pnand %p1280_p1, %p1277_p0 }
   0x8   :  { %1285 = shalt.err (!%p1282_p2)
}
   0x9   :  { %s1286_s18 = scalar_lea.vmem %s16_s10, 1024  ;;  %p1291_p4 = scmp.lt.s32.totalorder %s16_s10, %s16_s10 }
   0xa   :  { %p1287_p3 = scmp.ne.s32.totalorder %s16_s10, %s1286_s18  ;;  %p1292_p5 = scmp.lt.s32.totalorder %s1286_s18, %s1286_s18 }
   0xc   :  { %p1293_p6 = por %p1292_p5, %p1291_p4 }
   0xe   :  { %p1294_p7 = pnand %p1293_p6, %p1287_p3 }
  0x10   :  { %1297 = shalt.err (!%p1294_p7)
}
  0x11   :  { %s1349_s19 = smov 128   ;;  %s1350_s20 = smov 8  }
  0x12   :  { %21 = dma.hbm_to_vmem [thread:$0]  %s1591_s0, 1024, %s16_s10, [#allocation3], %s1349_s19, %s1349_s19, %s1350_s20  }
  0x13   :  { %s1351_s23 = smov [#allocation5]   ;;  %s1298_s27 = scalar_lea.hbm %s1592_s1, 1024 }
  0x14   :  { %s27_s24 = sshll.u32 %s1351_s23, 4  ;;  %p1299_p8 = scmp.ne.s32.totalorder %s1592_s1, %s1298_s27  ;;  %s28_s24 = int_to_ptr.vmem [resolvable:$true] %s27_s24 }
  0x15   :  { %p1302_p9 = scmp.lt.u32.totalorder %s1298_s27, %s1592_s1 }
  0x17   :  { %p1304_p10 = pnand %p1302_p9, %p1299_p8 }
  0x19   :  { %1307 = shalt.err (!%p1304_p10)
}
  0x1a   :  { %s1308_s4 = scalar_lea.vmem %s28_s24, 1024  ;;  %p1313_p12 = scmp.lt.s32.totalorder %s28_s24, %s28_s24 }
  0x1b   :  { %p1309_p11 = scmp.ne.s32.totalorder %s28_s24, %s1308_s4  ;;  %p1314_p13 = scmp.lt.s32.totalorder %s1308_s4, %s1308_s4 }
  0x1d   :  { %p1315_p0 = por %p1314_p13, %p1313_p12 }
  0x1f   :  { %p1316_p1 = pnand %p1315_p0, %p1309_p11 }
  0x21   :  { %1319 = shalt.err (!%p1316_p1)
}
  0x22   :  { %33 = dma.hbm_to_vmem [thread:$0]  %s1592_s1, 1024, %s28_s24, [#allocation6], %s1349_s19, %s1349_s19, %s1350_s20  }
  0x23   :  { %1342 = dma.done.wait [#allocation3], 1024  }
  0x24   :  { %1343 = vsyncadd [#allocation3], 4294966272 }
  0x25   :  { %1344 = dma.done.wait [#allocation6], 1024  }
  0x26   :  { %1345 = vsyncadd [#allocation6], 4294966272  ;;  %v1392_v0 = vld [vmem:[#allocation2] sm:$0xff]  ;;  %v1394_v1 = vld [vmem:[#allocation2 + $0x8] sm:$0xff]  ;;  %vm268_vm0 = vcmask 1040384   ;;  %vm245_vm1 = vcmask 130048  }
  0x27   :  { %v1396_v2 = vld [vmem:[#allocation5] sm:$0xff]  ;;  %v44_v3 = vadd.f32 %v1394_v1, %v1392_v0  ;;  %v1400_v4 = vld [vmem:[#allocation5 + $0x8] sm:$0xff]  ;;  %v1402_v5 = vld [vmem:[#allocation2 + $0x10] sm:$0xff] }
  0x28   :  { %v1404_v6 = vld [vmem:[#allocation2 + $0x18] sm:$0xff]  ;;  %v69_v7 = vadd.f32 %v1400_v4, %v1396_v2  ;;  %v1410_v9 = vld [vmem:[#allocation5 + $0x10] sm:$0xff]  ;;  %v1414_v11 = vld [vmem:[#allocation2 + $0x20] sm:$0xff] }
  0x29   :  { %v310_v8 = vadd.f32 %v1404_v6, %v1402_v5  ;;  %v1412_v10 = vld [vmem:[#allocation5 + $0x18] sm:$0xff]  ;;  %v45_v12 = vrot.slane %v44_v3, 4  ;;  %v1418_v14 = vld [vmem:[#allocation2 + $0x28] sm:$0xff]  ;;  %v1420_v15 = vld [vmem:[#allocation5 + $0x20] sm:$0xff] }
  0x2a   :  { %v334_v13 = vadd.f32 %v1412_v10, %v1410_v9  ;;  %v1422_v16 = vld [vmem:[#allocation5 + $0x28] sm:$0xff]  ;;  %v70_v17 = vrot.slane %v69_v7, 4  ;;  %v573_v19 = vadd.f32 %v1418_v14, %v1414_v11  ;;  %v1428_v21 = vld [vmem:[#allocation2 + $0x30] sm:$0xff]  ;;  %v1430_v22 = vld [vmem:[#allocation2 + $0x38] sm:$0xff] }
  0x2b   :  { %v311_v18 = vrot.slane %v310_v8, 4  ;;  %v597_v20 = vadd.f32 %v1422_v16, %v1420_v15  ;;  %v1432_v23 = vld [vmem:[#allocation5 + $0x30] sm:$0xff]  ;;  %v46_v24 = vadd.f32 %v45_v12, %v44_v3  ;;  %v836_v26 = vadd.f32 %v1430_v22, %v1428_v21  ;;  %v1436_v27 = vld [vmem:[#allocation5 + $0x38] sm:$0xff] }
  0x2c   :  { %v335_v25 = vrot.slane %v334_v13, 4  ;;  %v71_v28 = vadd.f32 %v70_v17, %v69_v7  ;;  %v574_v30 = vrot.slane %v573_v19, 4  ;;  %v860_v35 = vadd.f32 %v1436_v27, %v1432_v23 }
  0x2d   :  { %v312_v29 = vadd.f32 %v311_v18, %v310_v8  ;;  %v598_v31 = vrot.slane %v597_v20, 4  ;;  %v47_v32 = vrot.slane %v46_v24, 2  ;;  %v837_v34 = vrot.slane %v836_v26, 4 }
  0x2e   :  { %v336_v33 = vadd.f32 %v335_v25, %v334_v13  ;;  %v72_v36 = vrot.slane %v71_v28, 2  ;;  %v575_v38 = vadd.f32 %v574_v30, %v573_v19  ;;  %v861_v43 = vrot.slane %v860_v35, 4 }
  0x2f   :  { %v313_v37 = vrot.slane %v312_v29, 2  ;;  %v599_v39 = vadd.f32 %v598_v31, %v597_v20  ;;  %v48_v40 = vadd.f32 %v47_v32, %v46_v24  ;;  %v838_v42 = vadd.f32 %v837_v34, %v836_v26 }
  0x30   :  { %v337_v41 = vrot.slane %v336_v33, 2  ;;  %v73_v44 = vadd.f32 %v72_v36, %v71_v28  ;;  %v576_v46 = vrot.slane %v575_v38, 2  ;;  %v862_v51 = vadd.f32 %v861_v43, %v860_v35 }
  0x31   :  { %v314_v45 = vadd.f32 %v313_v37, %v312_v29  ;;  %v600_v47 = vrot.slane %v599_v39, 2  ;;  %v49_v48 = vrot.slane %v48_v40, 1  ;;  %v839_v50 = vrot.slane %v838_v42, 2 }
  0x32   :  { %v338_v49 = vadd.f32 %v337_v41, %v336_v33  ;;  %v74_v52 = vrot.slane %v73_v44, 1  ;;  %v577_v54 = vadd.f32 %v576_v46, %v575_v38  ;;  %v863_v59 = vrot.slane %v862_v51, 2 }
  0x33   :  { %v315_v53 = vrot.slane %v314_v45, 1  ;;  %v601_v55 = vadd.f32 %v600_v47, %v599_v39  ;;  %v50_v56 = vadd.f32 %v49_v48, %v48_v40  ;;  %v840_v58 = vadd.f32 %v839_v50, %v838_v42 }
  0x34   :  { %v339_v57 = vrot.slane %v338_v49, 1  ;;  %v75_v60 = vadd.f32 %v74_v52, %v73_v44  ;;  %v578_v62 = vrot.slane %v577_v54, 1  ;;  %v1440_v12 = vadd.f32 %v863_v59, %v862_v51 }
  0x35   :  { %v316_v61 = vadd.f32 %v315_v53, %v314_v45  ;;  %v602_v63 = vrot.slane %v601_v55, 1  ;;  %v52_v3 = vmul.f32 0.0625, %v50_v56  ;;  %v841_v8 = vrot.slane %v840_v58, 1 }
  0x36   :  { %v340_v7 = vadd.f32 %v339_v57, %v338_v49  ;;  %v76_v13 = vmul.f32 0.0625, %v75_v60  ;;  %v579_v18 = vadd.f32 %v578_v62, %v577_v54 }
  0x37   :  { %v317_v17 = vmul.f32 0.0625, %v316_v61  ;;  %v603_v19 = vadd.f32 %v602_v63, %v601_v55  ;;  %v1443_v20 = vsub.f32 %v1392_v0, %v52_v3  ;;  %v1446_v24 = vsub.f32 %v1394_v1, %v52_v3 }
  0x38   :  { %v341_v25 = vmul.f32 0.0625, %v340_v7  ;;  %v842_v26 = vadd.f32 %v841_v8, %v840_v58  ;;  %v1449_v28 = vsub.f32 %v1396_v2, %v76_v13  ;;  %v1452_v29 = vsub.f32 %v1400_v4, %v76_v13 }
  0x39   :  { %v1455_v30 = vsub.f32 %v1402_v5, %v317_v17  ;;  %v1458_v31 = vsub.f32 %v1404_v6, %v317_v17  ;;  %v55_v0 = vmul.f32 %v1443_v20, %v1443_v20  ;;  %v56_v1 = vmul.f32 %v1446_v24, %v1446_v24 }
  0x3a   :  { %v1465_v32 = vsub.f32 %v1410_v9, %v341_v25  ;;  %v1468_v2 = vsub.f32 %v1412_v10, %v341_v25  ;;  %v79_v4 = vmul.f32 %v1449_v28, %v1449_v28  ;;  %v80_v5 = vmul.f32 %v1452_v29, %v1452_v29 }
  0x3b   :  { %v320_v6 = vmul.f32 %v1455_v30, %v1455_v30  ;;  %v321_v33 = vmul.f32 %v1458_v31, %v1458_v31  ;;  %v57_v34 = vadd.f32 %v56_v1, %v55_v0  ;;  %v580_v35 = vmul.f32 0.0625, %v579_v18 }
  0x3c   :  { %v344_v9 = vmul.f32 %v1465_v32, %v1465_v32  ;;  %v345_v10 = vmul.f32 %v1468_v2, %v1468_v2  ;;  %v81_v36 = vadd.f32 %v80_v5, %v79_v4  ;;  %v604_v38 = vmul.f32 0.0625, %v603_v19 }
  0x3d   :  { %v322_v37 = vadd.f32 %v321_v33, %v320_v6  ;;  %v843_v39 = vmul.f32 0.0625, %v842_v26  ;;  %v58_v40 = vrot.slane %v57_v34, 4  ;;  %v1483_v42 = vsub.f32 %v1414_v11, %v580_v35 }
  0x3e   :  { %v346_v41 = vadd.f32 %v345_v10, %v344_v9  ;;  %v1486_v43 = vsub.f32 %v1418_v14, %v580_v35  ;;  %v82_v44 = vrot.slane %v81_v36, 4  ;;  %v1489_v46 = vsub.f32 %v1420_v15, %v604_v38 }
  0x3f   :  { %v323_v45 = vrot.slane %v322_v37, 4  ;;  %v1492_v47 = vsub.f32 %v1422_v16, %v604_v38  ;;  %v59_v48 = vadd.f32 %v58_v40, %v57_v34  ;;  %v583_v50 = vmul.f32 %v1483_v42, %v1483_v42 }
  0x40   :  { %v347_v49 = vrot.slane %v346_v41, 4  ;;  %v584_v11 = vmul.f32 %v1486_v43, %v1486_v43  ;;  %v83_v51 = vadd.f32 %v82_v44, %v81_v36  ;;  %v607_v14 = vmul.f32 %v1489_v46, %v1489_v46 }
  0x41   :  { %v324_v52 = vadd.f32 %v323_v45, %v322_v37  ;;  %v608_v15 = vmul.f32 %v1492_v47, %v1492_v47  ;;  %v60_v53 = vrot.slane %v59_v48, 2  ;;  %v1503_v55 = vsub.f32 %v1428_v21, %v843_v39 }
  0x42   :  { %v348_v54 = vadd.f32 %v347_v49, %v346_v41  ;;  %v585_v16 = vadd.f32 %v584_v11, %v583_v50  ;;  %v84_v56 = vrot.slane %v83_v51, 2  ;;  %v1506_v59 = vsub.f32 %v1430_v22, %v843_v39 }
  0x43   :  { %v325_v57 = vrot.slane %v324_v52, 2  ;;  %v609_v58 = vadd.f32 %v608_v15, %v607_v14  ;;  %v61_v60 = vadd.f32 %v60_v53, %v59_v48  ;;  %v846_v63 = vmul.f32 %v1503_v55, %v1503_v55 }
  0x44   :  { %v349_v61 = vrot.slane %v348_v54, 2  ;;  %v586_v62 = vrot.slane %v585_v16, 4  ;;  %v85_v3 = vadd.f32 %v84_v56, %v83_v51  ;;  %v847_v13 = vmul.f32 %v1506_v59, %v1506_v59 }
  0x45   :  { %v326_v7 = vadd.f32 %v325_v57, %v324_v52  ;;  %v610_v8 = vrot.slane %v609_v58, 4  ;;  %v62_v21 = vrot.slane %v61_v60, 1  ;;  %v865_v19 = vrot.slane %v1440_v12, 1 }
  0x46   :  { %v350_v17 = vadd.f32 %v349_v61, %v348_v54  ;;  %v587_v18 = vadd.f32 %v586_v62, %v585_v16  ;;  %v86_v25 = vrot.slane %v85_v3, 1  ;;  %v848_v0 = vadd.f32 %v847_v13, %v846_v63 }
  0x47   :  { %v327_v22 = vrot.slane %v326_v7, 1  ;;  %v611_v26 = vadd.f32 %v610_v8, %v609_v58  ;;  %v63_v1 = vadd.f32 %v62_v21, %v61_v60  ;;  %v866_v6 = vadd.f32 %v865_v19, %v1440_v12 }
  0x48   :  { %v351_v4 = vrot.slane %v350_v17, 1  ;;  %v588_v5 = vrot.slane %v587_v18, 2  ;;  %v87_v33 = vadd.f32 %v86_v25, %v85_v3  ;;  %v849_v10 = vrot.slane %v848_v0, 4 }
  0x49   :  { %v328_v34 = vadd.f32 %v327_v22, %v326_v7  ;;  %v612_v9 = vrot.slane %v611_v26, 2  ;;  %v64_v35 = vmul.f32 0.0625, %v63_v1  ;;  %v867_v38 = vmul.f32 0.0625, %v866_v6 }
  0x4a   :  { %v352_v36 = vadd.f32 %v351_v4, %v350_v17  ;;  %v589_v37 = vadd.f32 %v588_v5, %v587_v18  ;;  %v88_v39 = vmul.f32 0.0625, %v87_v33  ;;  %v850_v44 = vadd.f32 %v849_v10, %v848_v0 }
  0x4b   :  { %v329_v40 = vmul.f32 0.0625, %v328_v34  ;;  %v613_v41 = vadd.f32 %v612_v9, %v611_v26  ;;  %v65_v45 = vadd.f32 1e-05, %v64_v35  ;;  %v1515_v50 = vsub.f32 %v1432_v23, %v867_v38 }
  0x4c   :  { %v353_v48 = vmul.f32 0.0625, %v352_v36  ;;  %v590_v49 = vrot.slane %v589_v37, 1  ;;  %v89_v11 = vadd.f32 1e-05, %v88_v39  ;;  %v851_v52 = vrot.slane %v850_v44, 2 }
  0x4d   :  { %v330_v12 = vadd.f32 1e-05, %v329_v40  ;;  %v614_v51 = vrot.slane %v613_v41, 1  ;;  %1260 = vrsqrt.f32 %v65_v45  ;;  %v1518_v53 = vsub.f32 %v1436_v27, %v867_v38 }
  0x4e   :  { %v354_v14 = vadd.f32 1e-05, %v353_v48  ;;  %v591_v15 = vadd.f32 %v590_v49, %v589_v37  ;;  %1262 = vrsqrt.f32 %v89_v11  ;;  %v852_v16 = vadd.f32 %v851_v52, %v850_v44 }
  0x4f   :  { %v615_v54 = vadd.f32 %v614_v51, %v613_v41  ;;  %v870_v56 = vmul.f32 %v1515_v50, %v1515_v50  ;;  %1264 = vrsqrt.f32 %v330_v12  ;;  %v871_v23 = vmul.f32 %v1518_v53, %v1518_v53 }
  0x50   :  { %v592_v57 = vmul.f32 0.0625, %v591_v15  ;;  %1266 = vrsqrt.f32 %v354_v14  ;;  %v853_v60 = vrot.slane %v852_v16, 1 }
  0x51   :  { %v616_v58 = vmul.f32 0.0625, %v615_v54  ;;  %v872_v62 = vadd.f32 %v871_v23, %v870_v56 }
  0x52   :  { %v593_v61 = vadd.f32 1e-05, %v592_v57  ;;  %v854_v3 = vadd.f32 %v853_v60, %v852_v16 }
  0x53   :  { %v617_v63 = vadd.f32 1e-05, %v616_v58  ;;  %v873_v27 = vrot.slane %v872_v62, 4 }
  0x54   :  { %1268 = vrsqrt.f32 %v593_v61  ;;  %v855_v7 = vmul.f32 0.0625, %v854_v3 }
  0x55   :  { %1270 = vrsqrt.f32 %v617_v63  ;;  %v874_v8 = vadd.f32 %v873_v27, %v872_v62 }
  0x56   :  { %v856_v13 = vadd.f32 1e-05, %v855_v7 }
  0x57   :  { %v1261_v21 = vpop.eup %1260  ;;  %v875_v17 = vrot.slane %v874_v8, 2 }
  0x58   :  { %v1263_v18 = vpop.eup %1262  ;;  %v67_v19 = vmul.f32 %v1261_v21, %v1443_v20  ;;  %v68_v25 = vmul.f32 %v1261_v21, %v1446_v24  ;;  %1272 = vrsqrt.f32 %v856_v13 }
  0x59   :  { %v1265_v22 = vpop.eup %1264  ;;  %v91_v26 = vmul.f32 %v1263_v18, %v1449_v28  ;;  %v92_v0 = vmul.f32 %v1263_v18, %v1452_v29  ;;  %v876_v1 = vadd.f32 %v875_v17, %v874_v8 }
  0x5a   :  { %v1267_v4 = vpop.eup %1266  ;;  %v1199_v5 = vpack.c.bf16 %v68_v25, %v67_v19  ;;  %1147 = vmatprep.mubr.f32.mxu0 %v67_v19  ;;  %v1529_v6 = vmul.f32 %v1265_v22, %v1455_v30  ;;  %v1532_v33 = vmul.f32 %v1265_v22, %v1458_v31 }
  0x5b   :  { %v1203_v34 = vpack.c.bf16 %v92_v0, %v91_v26  ;;  %v258_v20 = vmul.f32 %v91_v26, %v67_v19  ;;  %v259_v9 = vmul.f32 %v92_v0, %v68_v25  ;;  %1154 = vmatprep.mubr.f32.mxu1 %v91_v26  ;;  %v1535_v24 = vmul.f32 %v1267_v4, %v1465_v32 }
  0x5c   :  { %1200 = vmatprep.subr.bf16.mxu0 %v1199_v5  ;;  %v1207_v28 = vpack.c.bf16 %v1532_v33, %v1529_v6  ;;  %v1540_v29 = vmul.f32 %v1267_v4, %v1468_v2  ;;  %v877_v30 = vrot.slane %v876_v1, 1 }
  0x5d   :  { %1204 = vmatprep.subr.bf16.mxu1 %v1203_v34  ;;  %1202 = vmatpush3.bf16.xpose.msra.mxu0 %v1199_v5  ;;  %v260_v31 = vadd.f32 %v259_v9, %v258_v20 }
  0x5e   :  { %v1269_v10 = vpop.eup %1268  ;;  %1206 = vmatpush3.bf16.xpose.msra.mxu1 %v1203_v34  ;;  %1208 = vmatprep.subr.bf16.mxu0 %v1207_v28  ;;  %v1211_v36 = vpack.c.bf16 %v1540_v29, %v1535_v24  ;;  %v878_v39 = vadd.f32 %v877_v30, %v876_v1 }
  0x5f   :  { %v1271_v35 = vpop.eup %1270  ;;  %v595_v32 = vmul.f32 %v1269_v10, %v1483_v42  ;;  %v596_v37 = vmul.f32 %v1269_v10, %v1486_v43  ;;  %v261_v40 = vrot.slane %v260_v31, 4 }
  0x60   :  { %v619_v38 = vmul.f32 %v1271_v35, %v1489_v46  ;;  %v620_v2 = vmul.f32 %v1271_v35, %v1492_v47  ;;  %1212 = vmatprep.subr.bf16.mxu1 %v1211_v36  ;;  %v879_v41 = vmul.f32 0.0625, %v878_v39 }
  0x61   :  { %v262_v48 = vadd.f32 %v261_v40, %v260_v31  ;;  %v1215_v49 = vpack.c.bf16 %v596_v37, %v595_v32 }
  0x62   :  { %v785_v44 = vmul.f32 %v619_v38, %v595_v32  ;;  %v786_v45 = vmul.f32 %v620_v2, %v596_v37  ;;  %v880_v11 = vadd.f32 1e-05, %v879_v41  ;;  %v1273_v51 = vpop.eup %1272  ;;  %v1219_v52 = vpack.c.bf16 %v620_v2, %v619_v38 }
  0x63   :  { %v263_v42 = vrot.slane %v262_v48, 2  ;;  %v858_v47 = vmul.f32 %v1273_v51, %v1503_v55  ;;  %v859_v14 = vmul.f32 %v1273_v51, %v1506_v59 }
  0x64   :  { %v787_v12 = vadd.f32 %v786_v45, %v785_v44  ;;  %1148 = vmatmul.mubr.f32.vlgmr.msra.gmra.mrb[0].mxu0 %v68_v25  ;;  %1274 = vrsqrt.f32 %v880_v11 }
  0x65   :  { %1155 = vmatmul.mubr.f32.vlgmr.msra.gmra.mrb[0].mxu1 %v92_v0  ;;  %1210 = vmatpush3.bf16.xpose.msra.mxu0 %v1207_v28  ;;  %v264_v46 = vadd.f32 %v263_v42, %v262_v48  ;;  %v1223_v56 = vpack.c.bf16 %v859_v14, %v858_v47 }
  0x66   :  { %v788_v43 = vrot.slane %v787_v12, 4  ;;  %1214 = vmatpush3.bf16.xpose.msra.mxu1 %v1211_v36  ;;  %1161 = vmatprep.mubr.f32.mxu0 %v1529_v6 }
  0x67   :  { %1168 = vmatprep.mubr.f32.mxu1 %v1535_v24  ;;  %1216 = vmatprep.subr.bf16.mxu0 %v1215_v49  ;;  %v265_v54 = vrot.slane %v264_v46, 1 }
  0x68   :  { %v789_v15 = vadd.f32 %v788_v43, %v787_v12  ;;  %1220 = vmatprep.subr.bf16.mxu1 %v1219_v52 }
  0x69   :  { %v266_v23 = vadd.f32 %v265_v54, %v264_v46 }
  0x6a   :  { %v790_v16 = vrot.slane %v789_v15, 2 }
  0x6b   :  { %v267_v62 = vmul.f32 %v266_v23, %v266_v23  ;;  %v279_v22 = vsel %vm268_vm0, %v266_v23, 0.0 }
  0x6c   :  { %v791_v57 = vadd.f32 %v790_v16, %v789_v15  ;;  %1162 = vmatmul.mubr.f32.vlgmr.msra.gmra.mrb[2].mxu0 %v1532_v33  ;;  %280 = vadd.xlane.f32.xlu1 %v279_v22 }
  0x6d   :  { %1169 = vmatmul.mubr.f32.vlgmr.msra.gmra.mrb[2].mxu1 %v1540_v29  ;;  %1218 = vmatpush3.bf16.xpose.msra.mxu0 %v1215_v49  ;;  %v269_v27 = vsel %vm268_vm0, %v267_v62, 0.0 }
  0x6e   :  { %v792_v58 = vrot.slane %v791_v57, 1  ;;  %1222 = vmatpush3.bf16.xpose.msra.mxu1 %v1219_v52  ;;  %1175 = vmatprep.mubr.f32.mxu0 %v595_v32  ;;  %v1275_v60 = vpop.eup %1274 }
  0x6f   :  { %1182 = vmatprep.mubr.f32.mxu1 %v619_v38  ;;  %1224 = vmatprep.subr.bf16.mxu0 %v1223_v56  ;;  %v882_v59 = vmul.f32 %v1275_v60, %v1515_v50  ;;  %v883_v61 = vmul.f32 %v1275_v60, %v1518_v53  ;;  %v522_v50 = vmul.f32 %v1535_v24, %v1529_v6 }
  0x70   :  { %v793_v55 = vadd.f32 %v792_v58, %v791_v57  ;;  %v523_v53 = vmul.f32 %v1540_v29, %v1532_v33 }
  0x71   :  { %v1227_v3 = vpack.c.bf16 %v883_v61, %v882_v59  ;;  %v1048_v5 = vmul.f32 %v882_v59, %v858_v47  ;;  %v1049_v6 = vmul.f32 %v883_v61, %v859_v14 }
  0x72   :  { %v805_v63 = vsel %vm268_vm0, %v793_v55, 0.0  ;;  %v524_v7 = vadd.f32 %v523_v53, %v522_v50  ;;  %v794_v1 = vmul.f32 %v793_v55, %v793_v55 }
  0x73   :  { %806 = vadd.xlane.f32.xlu0 %v805_v63  ;;  %1228 = vmatprep.subr.bf16.mxu1 %v1227_v3  ;;  %v1050_v33 = vadd.f32 %v1049_v6, %v1048_v5 }
  0x74   :  { %1176 = vmatmul.mubr.f32.vlgmr.msra.gmra.mrb[4].mxu0 %v596_v37  ;;  %v525_v8 = vrot.slane %v524_v7, 4  ;;  %v795_v4 = vsel %vm268_vm0, %v794_v1, 0.0 }
  0x75   :  { %1183 = vmatmul.mubr.f32.vlgmr.msra.gmra.mrb[4].mxu1 %v620_v2  ;;  %1226 = vmatpush3.bf16.xpose.msra.mxu0 %v1223_v56  ;;  %v1051_v34 = vrot.slane %v1050_v33, 4 }
  0x76   :  { %1230 = vmatpush3.bf16.xpose.msra.mxu1 %v1227_v3  ;;  %1189 = vmatprep.mubr.f32.mxu0 %v858_v47  ;;  %v526_v13 = vadd.f32 %v525_v8, %v524_v7 }
  0x77   :  { %1196 = vmatprep.mubr.f32.mxu1 %v882_v59  ;;  %270 = vadd.xlane.f32.xlu0 %v269_v27  ;;  %v1052_v28 = vadd.f32 %v1051_v34, %v1050_v33 }
  0x78   :  { %v527_v21 = vrot.slane %v526_v13, 2 }
  0x79   :  { %v1053_v36 = vrot.slane %v1052_v28, 2 }
  0x7a   :  { %v528_v17 = vadd.f32 %v527_v21, %v526_v13 }
  0x7b   :  { %v1054_v39 = vadd.f32 %v1053_v36, %v1052_v28 }
  0x7c   :  { %1190 = vmatmul.mubr.f32.vlgmr.msra.gmra.mrb[6].mxu0 %v859_v14  ;;  %v529_v18 = vrot.slane %v528_v17, 1 }
  0x7d   :  { %1197 = vmatmul.mubr.f32.vlgmr.msra.gmra.mrb[6].mxu1 %v883_v61  ;;  %v1055_v49 = vrot.slane %v1054_v39, 1 }
  0x7e   :  { %v530_v19 = vadd.f32 %v529_v18, %v528_v17 }
  0x7f   :  { %v1056_v42 = vadd.f32 %v1055_v49, %v1054_v39 }
  0x80   :  { %v531_v25 = vmul.f32 %v530_v19, %v530_v19  ;;  %v542_v0 = vsel %vm268_vm0, %v530_v19, 0.0 }
  0x81   :  { %543 = vadd.xlane.f32.xlu1 %v542_v0  ;;  %v1057_v54 = vmul.f32 %v1056_v42, %v1056_v42  ;;  %v1068_v3 = vsel %vm268_vm0, %v1056_v42, 0.0 }
  0x82   :  { %v532_v26 = vsel %vm268_vm0, %v531_v25, 0.0 }
  0x83   :  { %533 = vadd.xlane.f32.xlu0 %v532_v26  ;;  %v1058_v58 = vsel %vm268_vm0, %v1057_v54, 0.0 }
  0x85   :  { %796 = vadd.xlane.f32.xlu1 %v795_v4 }
  0xf9   :  { %v281_v7 = vpop.xlane.xlu1 %280 }
  0xfa   :  { %v282_v8 = vrot.slane %v281_v7, 4 }
  0xfc   :  { %v283_v17 = vadd.f32 %v282_v8, %v281_v7 }
  0xfe   :  { %v284_v25 = vrot.slane %v283_v17, 2 }
 0x100   :  { %v807_v27 = vpop.xlane.xlu0 %806  ;;  %v285_v33 = vadd.f32 %v284_v25, %v283_v17 }
 0x104   :  { %v271_v50 = vpop.xlane.xlu0 %270 }
 0x105   :  { %v272_v53 = vrot.slane %v271_v50, 4 }
 0x107   :  { %v273_v13 = vadd.f32 %v272_v53, %v271_v50 }
 0x109   :  { %v274_v19 = vrot.slane %v273_v13, 2 }
 0x10b   :  { %v275_v5 = vadd.f32 %v274_v19, %v273_v13 }
 0x10e   :  { %v544_v18 = vpop.xlane.xlu1 %543 }
 0x10f   :  { %v545_v0 = vrot.slane %v544_v18, 4 }
 0x110   :  { %v534_v21 = vpop.xlane.xlu0 %533 }
 0x111   :  { %v535_v22 = vrot.slane %v534_v21, 4 }
 0x112   :  { %v797_v4 = vpop.xlane.xlu1 %796 }
 0x113   :  { %v536_v34 = vadd.f32 %v535_v22, %v534_v21 }
 0x137   :  { %v1149_v20 = vpop.f32.mrb[0].mxu0 }
 0x138   :  { %v1156_v9 = vpop.f32.mrb[0].mxu1  ;;  %v159_v24 = vpop.f32.mrb[1].mxu0 }
 0x139   :  { %v244_v29 = vmul.f32 %v1156_v9, %v1149_v20  ;;  %v234_v30 = vpop.f32.mrb[1].mxu1  ;;  %v546_v20 = vadd.f32 %v545_v0, %v544_v18 }
 0x13a   :  { %v243_v10 = vmul.f32 %v234_v30, %v159_v24  ;;  %v276_v24 = vrot.slane %v275_v5, 1  ;;  %v537_v30 = vrot.slane %v536_v34, 2 }
 0x13b   :  { %v247_v31 = vsel %vm245_vm1, %v244_v29, 0.0  ;;  %v286_v29 = vrot.slane %v285_v33, 1  ;;  %v547_v36 = vrot.slane %v546_v20, 2 }
 0x13c   :  { %v246_v35 = vsel %vm245_vm1, %v243_v10, 0.0  ;;  %v798_v10 = vrot.slane %v797_v4, 4 }
 0x13d   :  { %v248_v32 = vadd.f32 %v247_v31, %v246_v35  ;;  %v808_v35 = vrot.slane %v807_v27, 4  ;;  %v548_v49 = vadd.f32 %v547_v36, %v546_v20 }
 0x13f   :  { %249 = vadd.xlane.f32.xlu0 %v248_v32  ;;  %v1163_v37 = vpop.f32.mrb[2].mxu0 }
 0x140   :  { %v1170_v38 = vpop.f32.mrb[2].mxu1  ;;  %v424_v2 = vpop.f32.mrb[3].mxu0 }
 0x141   :  { %v509_v40 = vmul.f32 %v1170_v38, %v1163_v37  ;;  %v499_v41 = vpop.f32.mrb[3].mxu1  ;;  %v277_v38 = vadd.f32 %v276_v24, %v275_v5 }
 0x142   :  { %v508_v44 = vmul.f32 %v499_v41, %v424_v2  ;;  %v799_v41 = vadd.f32 %v798_v10, %v797_v4 }
 0x143   :  { %v511_v45 = vsel %vm245_vm1, %v509_v40, 0.0  ;;  %v287_v40 = vadd.f32 %v286_v29, %v285_v33 }
 0x144   :  { %v510_v48 = vsel %vm245_vm1, %v508_v44, 0.0  ;;  %v538_v44 = vadd.f32 %v537_v30, %v536_v34 }
 0x145   :  { %v512_v11 = vadd.f32 %v511_v45, %v510_v48  ;;  %v809_v45 = vadd.f32 %v808_v35, %v807_v27 }
 0x147   :  { %513 = vadd.xlane.f32.xlu1 %v512_v11  ;;  %v1177_v12 = vpop.f32.mrb[4].mxu0  ;;  %v810_v42 = vrot.slane %v809_v45, 2 }
 0x148   :  { %v1184_v51 = vpop.f32.mrb[4].mxu1  ;;  %v687_v52 = vpop.f32.mrb[5].mxu0 }
 0x149   :  { %v772_v43 = vmul.f32 %v1184_v51, %v1177_v12  ;;  %v762_v46 = vpop.f32.mrb[5].mxu1  ;;  %v800_v12 = vrot.slane %v799_v41, 2 }
 0x14a   :  { %v771_v47 = vmul.f32 %v762_v46, %v687_v52  ;;  %v539_v52 = vrot.slane %v538_v44, 1 }
 0x14b   :  { %v774_v14 = vsel %vm245_vm1, %v772_v43, 0.0 }
 0x14c   :  { %v773_v15 = vsel %vm245_vm1, %v771_v47, 0.0  ;;  %v549_v47 = vrot.slane %v548_v49, 1 }
 0x14d   :  { %v775_v16 = vadd.f32 %v774_v14, %v773_v15 }
 0x14f   :  { %776 = vadd.xlane.f32.xlu0 %v775_v16  ;;  %v1191_v56 = vpop.f32.mrb[6].mxu0  ;;  %v540_v16 = vadd.f32 %v539_v52, %v538_v44 }
 0x150   :  { %v1198_v57 = vpop.f32.mrb[6].mxu1  ;;  %v950_v23 = vpop.f32.mrb[7].mxu0 }
 0x151   :  { %v1035_v60 = vmul.f32 %v1198_v57, %v1191_v56  ;;  %v1025_v55 = vpop.f32.mrb[7].mxu1  ;;  %v801_v56 = vadd.f32 %v800_v12, %v799_v41 }
 0x152   :  { %v1034_v59 = vmul.f32 %v1025_v55, %v950_v23 }
 0x153   :  { %1059 = vadd.xlane.f32.xlu0 %v1058_v58  ;;  %v1037_v61 = vsel %vm245_vm1, %v1035_v60, 0.0  ;;  %v550_v58 = vadd.f32 %v549_v47, %v548_v49  ;;  %v811_v60 = vadd.f32 %v810_v42, %v809_v45 }
 0x154   :  { %v1036_v62 = vsel %vm245_vm1, %v1034_v59, 0.0 }
 0x155   :  { %v1038_v63 = vadd.f32 %v1037_v61, %v1036_v62  ;;  %v802_v62 = vrot.slane %v801_v56, 1  ;;  %v812_v50 = vrot.slane %v811_v60, 1 }
 0x157   :  { %1039 = vadd.xlane.f32.xlu1 %v1038_v63  ;;  %v803_v21 = vadd.f32 %v802_v62, %v801_v56  ;;  %v813_v19 = vadd.f32 %v812_v50, %v811_v60 }
 0x15b   :  { %1069 = vadd.xlane.f32.xlu1 %v1068_v3 }
 0x1cc   :  { %v250_v26 = vpop.xlane.xlu0 %249 }
 0x1cd   :  { %v251_v1 = vrot.slane %v250_v26, 4 }
 0x1cf   :  { %v252_v6 = vadd.f32 %v251_v1, %v250_v26 }
 0x1d1   :  { %v253_v9 = vrot.slane %v252_v6, 2 }
 0x1d3   :  { %v254_v28 = vadd.f32 %v253_v9, %v252_v6 }
 0x1d4   :  { %v514_v31 = vpop.xlane.xlu1 %513 }
 0x1d5   :  { %v515_v32 = vrot.slane %v514_v31, 4  ;;  %v255_v37 = vrot.slane %v254_v28, 1 }
 0x1d7   :  { %v516_v2 = vadd.f32 %v515_v32, %v514_v31  ;;  %v256_v39 = vadd.f32 %v255_v37, %v254_v28 }
 0x1d9   :  { %v517_v48 = vrot.slane %v516_v2, 2  ;;  %1231 = vpush %v256_v39 }
 0x1da   :  { %1233 = vpush %v277_v38 }
 0x1db   :  { %1235 = vpush %v287_v40  ;;  %v518_v11 = vadd.f32 %v517_v48, %v516_v2 }
 0x1dc   :  { %v777_v51 = vpop.xlane.xlu0 %776 }
 0x1dd   :  { %v778_v43 = vrot.slane %v777_v51, 4  ;;  %v519_v46 = vrot.slane %v518_v11, 1 }
 0x1df   :  { %v779_v14 = vadd.f32 %v778_v43, %v777_v51  ;;  %v520_v15 = vadd.f32 %v519_v46, %v518_v11 }
 0x1e0   :  { %v1060_v54 = vpop.xlane.xlu0 %1059 }
 0x1e1   :  { %v780_v57 = vrot.slane %v779_v14, 2  ;;  %v1061_v23 = vrot.slane %v1060_v54, 4  ;;  %1237 = vpush %v520_v15 }
 0x1e2   :  { %1239 = vpush %v540_v16 }
 0x1e3   :  { %v1062_v55 = vadd.f32 %v1061_v23, %v1060_v54  ;;  %1241 = vpush %v550_v58  ;;  %v781_v59 = vadd.f32 %v780_v57, %v779_v14 }
 0x1e4   :  { %v1040_v61 = vpop.xlane.xlu1 %1039 }
 0x1e5   :  { %v1063_v63 = vrot.slane %v1062_v55, 2  ;;  %v1041_v3 = vrot.slane %v1040_v61, 4  ;;  %v782_v27 = vrot.slane %v781_v59, 1 }
 0x1e7   :  { %v1042_v53 = vadd.f32 %v1041_v3, %v1040_v61  ;;  %v783_v7 = vadd.f32 %v782_v27, %v781_v59  ;;  %v1064_v8 = vadd.f32 %v1063_v63, %v1062_v55 }
 0x1e8   :  { %v1070_v13 = vpop.xlane.xlu1 %1069 }
 0x1e9   :  { %v1043_v17 = vrot.slane %v1042_v53, 2  ;;  %v1071_v18 = vrot.slane %v1070_v13, 4  ;;  %1243 = vpush %v783_v7  ;;  %v1065_v26 = vrot.slane %v1064_v8, 1 }
 0x1ea   :  { %1245 = vpush %v803_v21 }
 0x1eb   :  { %v1072_v25 = vadd.f32 %v1071_v18, %v1070_v13  ;;  %1247 = vpush %v813_v19  ;;  %v1044_v22 = vadd.f32 %v1043_v17, %v1042_v53  ;;  %v1066_v6 = vadd.f32 %v1065_v26, %v1064_v8 }
 0x1ed   :  { %v1073_v0 = vrot.slane %v1072_v25, 2  ;;  %v1045_v1 = vrot.slane %v1044_v22, 1 }
 0x1ef   :  { %v1074_v4 = vadd.f32 %v1073_v0, %v1072_v25  ;;  %v1046_v5 = vadd.f32 %v1045_v1, %v1044_v22 }
 0x1f1   :  { %1249 = vpush %v1046_v5  ;;  %v1075_v33 = vrot.slane %v1074_v4, 1 }
 0x1f2   :  { %1251 = vpush %v1066_v6 }
 0x1f3   :  { %v1076_v34 = vadd.f32 %v1075_v33, %v1074_v4 }
 0x1f5   :  { %1253 = vpush %v1076_v34 }
 0x20a   :  { %s1232_s1 = spop %1231 }
 0x20b   :  { %s289_s6 = smul.f32 0.005, %s1232_s1  ;;  %s1234_s7 = spop %1233 }
 0x20c   :  { %s292_s8 = smul.f32 0.995, %s1234_s7  ;;  %s1236_s11 = spop %1235 }
 0x20d   :  { %s290_s9 = smul.f32 0.0625, %s289_s6 }
 0x20e   :  { %s293_s10 = smul.f32 0.0625, %s292_s8 }
 0x20f   :  { %s291_s12 = smul.f32 0.0625, %s290_s9 }
 0x210   :  { %s294_s13 = smul.f32 0.0625, %s293_s10 }
 0x211   :  { %s296_s15 = smul.f32 2.0, %s1236_s11 }
 0x212   :  { %s1238_s14 = spop %1237  ;;  %s295_s29 = sadd.f32 %s294_s13, %s291_s12 }
 0x213   :  { %s1240_s16 = spop %1239  ;;  %s552_s17 = smul.f32 0.005, %s1238_s14 }
 0x214   :  { %s555_s18 = smul.f32 0.995, %s1240_s16  ;;  %s1242_s23 = spop %1241 }
 0x215   :  { %s553_s19 = smul.f32 0.0625, %s552_s17 }
 0x216   :  { %s556_s20 = smul.f32 0.0625, %s555_s18 }
 0x217   :  { %s1576_s21 = smul.f32 0.0625, %s296_s15 }
 0x218   :  { %s554_s22 = smul.f32 0.0625, %s553_s19 }
 0x219   :  { %s557_s24 = smul.f32 0.0625, %s556_s20  ;;  %s298_s1 = ssub.f32 %s295_s29, %s1576_s21 }
 0x21a   :  { %s1244_s25 = spop %1243  ;;  %s559_s27 = smul.f32 2.0, %s1242_s23 }
 0x21b   :  { %s815_s26 = smul.f32 0.005, %s1244_s25  ;;  %s1246_s28 = spop %1245 }
 0x21c   :  { %s818_s3 = smul.f32 0.995, %s1246_s28  ;;  %s1248_s4 = spop %1247 }
 0x21d   :  { %s816_s30 = smul.f32 0.0625, %s815_s26  ;;  %s558_s7 = sadd.f32 %s557_s24, %s554_s22 }
 0x21e   :  { %s819_s5 = smul.f32 0.0625, %s818_s3  ;;  %s299_s28 = sadd.f32 128.0, %s298_s1 }
 0x21f   :  { %s817_s0 = smul.f32 0.0625, %s816_s30 }
 0x220   :  { %s822_s6 = smul.f32 2.0, %s1248_s4 }
 0x221   :  { %s820_s8 = smul.f32 0.0625, %s819_s5 }
 0x222   :  { %s560_s9 = smul.f32 0.0625, %s559_s27  ;;  %s1250_s10 = spop %1249 }
 0x223   :  { %s821_s11 = sadd.f32 %s820_s8, %s817_s0  ;;  %s1078_s14 = smul.f32 0.005, %s1250_s10 }
 0x224   :  { %s823_s15 = smul.f32 0.0625, %s822_s6  ;;  %s1252_s16 = spop %1251 }
 0x225   :  { %s561_s17 = ssub.f32 %s558_s7, %s560_s9  ;;  %s1079_s18 = smul.f32 0.0625, %s1078_s14 }
 0x226   :  { %s1081_s19 = smul.f32 0.995, %s1252_s16  ;;  %s1254_s20 = spop %1253 }
 0x227   :  { %s824_s12 = ssub.f32 %s821_s11, %s823_s15  ;;  %s1080_s13 = smul.f32 0.0625, %s1079_s18 }
 0x228   :  { %s1082_s23 = smul.f32 0.0625, %s1081_s19  ;;  %s562_s25 = sadd.f32 128.0, %s561_s17 }
 0x229   :  { %s1085_s26 = smul.f32 2.0, %s1254_s20  ;;  %s825_s29 = sadd.f32 128.0, %s824_s12 }
 0x22a   :  { %s1083_s21 = smul.f32 0.0625, %s1082_s23  ;;  %s566_s27 = sadd.f32 %s562_s25, %s299_s28 }
 0x22b   :  { %s1086_s22 = smul.f32 0.0625, %s1085_s26  ;;  %s1352_s0 = smov [#allocation7]  }
 0x22c   :  { %s1084_s24 = sadd.f32 %s1083_s21, %s1080_s13  ;;  %s1101_s5 = sshll.u32 %s1352_s0, 4  ;;  %s1102_s5 = int_to_ptr.vmem [resolvable:$true] %s1101_s5 }
 0x22d   :  { %s829_s3 = sadd.f32 %s825_s29, %s566_s27  ;;  %s1320_s7 = scalar_lea.vmem %s1102_s5, 128 }
 0x22e   :  { %s1087_s30 = ssub.f32 %s1084_s24, %s1086_s22  ;;  %p1321_p2 = scmp.ne.s32.totalorder %s1102_s5, %s1320_s7 }
 0x22f   :  { %p1325_p3 = scmp.lt.s32.totalorder %s1102_s5, %s1102_s5  ;;  %p1326_p4 = scmp.lt.s32.totalorder %s1320_s7, %s1320_s7 }
 0x230   :  { %s1088_s4 = sadd.f32 128.0, %s1087_s30 }
 0x231   :  { %p1327_p5 = por %p1326_p4, %p1325_p3 }
 0x232   :  { %s1092_s6 = sadd.f32 %s1088_s4, %s829_s3 }
 0x233   :  { %p1328_p6 = pnand %p1327_p5, %p1321_p2 }
 0x234   :  { %v1093_v20 = vstv %s1092_s6 }
 0x235   :  { %1094 = vst [vmem:[#allocation7] sm:$0xff] %v1093_v20 }
 0x236   :  { %1331 = shalt.err (!%p1328_p6)
}
 0x237   :  { %s1332_s9 = scalar_lea.hbm %s1593_s2, 128 }
 0x238   :  { %p1333_p7 = scmp.ne.s32.totalorder %s1593_s2, %s1332_s9  ;;  %p1336_p8 = scmp.lt.u32.totalorder %s1332_s9, %s1593_s2 }
 0x23a   :  { %p1338_p9 = pnand %p1336_p8, %p1333_p7 }
 0x23c   :  { %1341 = shalt.err (!%p1338_p9)
}
 0x23d   :  { %1104 = dma.vmem_to_hbm [thread:$0]  %s1102_s5, 128, %s1593_s2, [#allocation4]  }
 0x23e   :  { %1346 = dma.done.wait [#allocation4], 128  }
 0x23f   :  { %1347 = vsyncadd [#allocation4], 4294967168 }
 0x240   :  { %1108 = vsyncpa [#allocation3], 1 }
 0x241   :  { %1109 = vsyncpa [#allocation6], 1 }
 0x242   :  { %1110 = vsyncpa [#allocation4], 1 }

</bundles_post_ra>
